<compile_context>
chip_gen: v6e
topology: v6e:2x2x1
jax: 0.10.0
libtpu: 0.0.40
codegen_flags: <defaults>
</compile_context>

<pallas_src>
import jax
import jax.numpy as jnp
from jax.experimental import pallas as pl
from jax.experimental.pallas import tpu as pltpu


def _round_up(n, m):
    return ((n + m - 1) // m) * m


def envelope_mlp_kernel(x_ref, w1_ref, b1_ref, w2_ref, b2_ref,
                        w3e_ref, b3e_ref, w3b_ref, w4_ref, b4_ref,
                        out_ref):
    x = x_ref[...]

    # envelope_extraction_layers (dropout = identity at inference)
    h1 = jnp.dot(x, w1_ref[...], preferred_element_type=jnp.float32) + b1_ref[...]
    h1 = jnp.maximum(h1, 0.0)
    h2 = jnp.dot(h1, w2_ref[...], preferred_element_type=jnp.float32) + b2_ref[...]
    h2 = jnp.maximum(h2, 0.0)

    # Fused tail matmul: [ h2 @ W3[:H2] + b3  |  h2 @ We + be ]  -> (tb, H3 + 1)
    fused = jnp.dot(h2, w3e_ref[...], preferred_element_type=jnp.float32) + b3e_ref[...]
    h3_dim = w3b_ref.shape[1]                           # = F/64

    # envelope_layer output (last column), ReLU
    env = jnp.maximum(fused[:, h3_dim:], 0.0)           # (tb, 1)

    # higher_processing_layers on cat([h2, env]):
    #   cat(h2, env) @ W3 == h2 @ W3[:H2, :] + env * W3[H2:, :]
    h3 = jnp.maximum(fused[:, :h3_dim] + env * w3b_ref[...], 0.0)

    logit = jnp.dot(h3, w4_ref[...], preferred_element_type=jnp.float32) + b4_ref[...]
    out = jax.nn.sigmoid(logit)                         # (tb, 1)

    # Pack [sigmoid_output | envelope] into one (tb, 2) output stream.
    out_ref[:, 0:1] = out
    out_ref[:, 1:2] = env


def envelope_mlp_forward(x, params, *, tile_b=2048):
    """x: (B, F) float32. params: torch-layout weights (in, out) and (1, out) biases.

    Returns (output (B,1), envelope (B,1)).
    """
    B, F = x.shape
    H2 = params["w2"].shape[1]

    # Pack the tail: envelope Linear fused into the first higher-processing Linear.
    w3a = params["w3"][:H2, :]                                 # (H2, H3)
    w3b = params["w3"][H2:, :]                                 # (1, H3)  applied to env
    w3e = jnp.concatenate([w3a, params["we"]], axis=1)         # (H2, H3 + 1)
    b3e = jnp.concatenate([params["b3"], params["be"]], axis=1)  # (1, H3 + 1)

    # Tile the batch; tile must be a multiple of 8 (sublane constraint).
    tb = min(tile_b, _round_up(B, 8))
    Bp = _round_up(B, tb)
    if Bp != B:
        x = jnp.pad(x, ((0, Bp - B), (0, 0)))
    grid = (Bp // tb,)

    def row_map(i):
        return (i, 0)

    def const_map(i):
        return (0, 0)

    def wspec(arr):
        return pl.BlockSpec(arr.shape, const_map)

    weights = (params["w1"], params["b1"], params["w2"], params["b2"],
               w3e, b3e, w3b, params["w4"], params["b4"])

    packed = pl.pallas_call(
        envelope_mlp_kernel,
        out_shape=jax.ShapeDtypeStruct((Bp, 2), jnp.float32),
        grid_spec=pltpu.PrefetchScalarGridSpec(
            num_scalar_prefetch=0,
            grid=grid,
            in_specs=[pl.BlockSpec((tb, F), row_map)] + [wspec(w) for w in weights],
            out_specs=pl.BlockSpec((tb, 2), row_map),
        ),
        compiler_params=pltpu.CompilerParams(
            dimension_semantics=("parallel",),   # shard batch tiles across TCs (v7x)
        ),
    )(x, *weights)

    out = packed[:B, 0:1]
    env = packed[:B, 1:2]
    return out, env


def init_params(key, n_features):
    F = n_features
    H1, H2, H3 = F // 4, F // 16, F // 64
    ks = jax.random.split(key, 10)

    def lin(kw, kb, fan_in, fan_out):
        # PyTorch Linear default init: U(-1/sqrt(fan_in), 1/sqrt(fan_in)).
        bound = 1.0 / float(fan_in) ** 0.5
        w = jax.random.uniform(kw, (fan_in, fan_out), jnp.float32, -bound, bound)
        b = jax.random.uniform(kb, (1, fan_out), jnp.float32, -bound, bound)
        return w, b

    w1, b1 = lin(ks[0], ks[1], F, H1)
    w2, b2 = lin(ks[2], ks[3], H1, H2)
    we, be = lin(ks[4], ks[5], H2, 1)
    w3, b3 = lin(ks[6], ks[7], H2 + 1, H3)
    w4, b4 = lin(ks[8], ks[9], H3, 1)

    return {"w1": w1, "b1": b1, "w2": w2, "b2": b2,
            "we": we, "be": be, "w3": w3, "b3": b3,
            "w4": w4, "b4": b4}


def reference_forward(x, p):
    h1 = jnp.maximum(x @ p["w1"] + p["b1"], 0.0)
    h2 = jnp.maximum(h1 @ p["w2"] + p["b2"], 0.0)
    env = jnp.maximum(h2 @ p["we"] + p["be"], 0.0)
    cat = jnp.concatenate([h2, env], axis=1)
    h3 = jnp.maximum(cat @ p["w3"] + p["b3"], 0.0)
    out = jax.nn.sigmoid(h3 @ p["w4"] + p["b4"])
    return out, env


if __name__ == "__main__":
    key = jax.random.PRNGKey(0)
    k_x, k_x2, k_p = jax.random.split(key, 3)

    B, F = 8, 256   # batch=8, n_features=256 -> hidden dims 64, 16, 4
    x = jax.random.normal(k_x, (B, F), jnp.float32)
    params = init_params(k_p, F)

    out, env = envelope_mlp_forward(x, params)
    out, env = jax.block_until_ready((out, env))

    ref_out, ref_env = reference_forward(x, params)
    assert out.shape == (B, 1) and env.shape == (B, 1)
    assert jnp.allclose(out, ref_out, atol=1e-5, rtol=1e-5)
    assert jnp.allclose(env, ref_env, atol=1e-5, rtol=1e-5)

    # Second check: batch not a multiple of the tile -> exercises grid + padding path.
    B2 = 200
    x2 = jax.random.normal(k_x2, (B2, F), jnp.float32)
    out2, env2 = jax.block_until_ready(envelope_mlp_forward(x2, params, tile_b=64))
    ref_out2, ref_env2 = reference_forward(x2, params)
    assert out2.shape == (B2, 1) and env2.shape == (B2, 1)
    assert jnp.allclose(out2, ref_out2, atol=1e-5, rtol=1e-5)
    assert jnp.allclose(env2, ref_env2, atol=1e-5, rtol=1e-5)

    print("KERNEL_OK")
</pallas_src>

<mosaic_0001>
module attributes {stable_mosaic.version = 11 : i64} {
  func.func @envelope_mlp_kernel(%arg0: i32, %arg1: memref<8x256xf32, #tpu.memory_space<vmem>>, %arg2: memref<256x64xf32, #tpu.memory_space<vmem>>, %arg3: memref<1x64xf32, #tpu.memory_space<vmem>>, %arg4: memref<64x16xf32, #tpu.memory_space<vmem>>, %arg5: memref<1x16xf32, #tpu.memory_space<vmem>>, %arg6: memref<16x5xf32, #tpu.memory_space<vmem>>, %arg7: memref<1x5xf32, #tpu.memory_space<vmem>>, %arg8: memref<1x4xf32, #tpu.memory_space<vmem>>, %arg9: memref<4x1xf32, #tpu.memory_space<vmem>>, %arg10: memref<1x1xf32, #tpu.memory_space<vmem>>, %arg11: memref<8x2xf32, #tpu.memory_space<vmem>>) attributes {dimension_semantics = [#tpu.dimension_semantics<parallel>], iteration_bounds = array<i64: 1>, scalar_prefetch = 0 : i64, scratch_operands = 0 : i64, tpu.core_type = #tpu.core_type<tc>, window_params = [{transform_indices = @transform_0, window_bounds = array<i64: 8, 256>}, {pipeline_mode = #tpu.pipeline_mode<synchronous>, transform_indices = @transform_1, window_bounds = array<i64: 256, 64>}, {pipeline_mode = #tpu.pipeline_mode<synchronous>, transform_indices = @transform_2, window_bounds = array<i64: 1, 64>}, {pipeline_mode = #tpu.pipeline_mode<synchronous>, transform_indices = @transform_3, window_bounds = array<i64: 64, 16>}, {pipeline_mode = #tpu.pipeline_mode<synchronous>, transform_indices = @transform_4, window_bounds = array<i64: 1, 16>}, {pipeline_mode = #tpu.pipeline_mode<synchronous>, transform_indices = @transform_5, window_bounds = array<i64: 16, 5>}, {pipeline_mode = #tpu.pipeline_mode<synchronous>, transform_indices = @transform_6, window_bounds = array<i64: 1, 5>}, {pipeline_mode = #tpu.pipeline_mode<synchronous>, transform_indices = @transform_7, window_bounds = array<i64: 1, 4>}, {pipeline_mode = #tpu.pipeline_mode<synchronous>, transform_indices = @transform_8, window_bounds = array<i64: 4, 1>}, {pipeline_mode = #tpu.pipeline_mode<synchronous>, transform_indices = @transform_9, window_bounds = array<i64: 1, 1>}, {transform_indices = @transform_10, window_bounds = array<i64: 8, 2>}]} {
    %c0 = arith.constant 0 : index
    %c0_0 = arith.constant 0 : index
    %0 = vector.load %arg1[%c0, %c0_0] : memref<8x256xf32, #tpu.memory_space<vmem>>, vector<8x256xf32>
    %c0_1 = arith.constant 0 : index
    %c0_2 = arith.constant 0 : index
    %1 = vector.load %arg2[%c0_1, %c0_2] : memref<256x64xf32, #tpu.memory_space<vmem>>, vector<256x64xf32>
    %cst = arith.constant dense<0.000000e+00> : vector<8x64xf32>
    %2 = tpu.matmul %0, %1, %cst {dimension_numbers = #tpu.dot_dimension_numbers<[1], [0], [0], [1], [0, 0, 1, 1], [], []>} : vector<8x256xf32>, vector<256x64xf32>, vector<8x64xf32> -> vector<8x64xf32>
    %c0_3 = arith.constant 0 : index
    %c0_4 = arith.constant 0 : index
    %3 = vector.load %arg3[%c0_3, %c0_4] : memref<1x64xf32, #tpu.memory_space<vmem>>, vector<1x64xf32>
    %4 = vector.broadcast %3 : vector<1x64xf32> to vector<8x64xf32>
    %5 = arith.addf %2, %4 : vector<8x64xf32>
    %cst_5 = arith.constant 0.000000e+00 : f32
    %6 = vector.broadcast %cst_5 : f32 to vector<8x64xf32>
    %7 = arith.maximumf %5, %6 : vector<8x64xf32>
    %c0_6 = arith.constant 0 : index
    %c0_7 = arith.constant 0 : index
    %8 = vector.load %arg4[%c0_6, %c0_7] : memref<64x16xf32, #tpu.memory_space<vmem>>, vector<64x16xf32>
    %cst_8 = arith.constant dense<0.000000e+00> : vector<8x16xf32>
    %9 = tpu.matmul %7, %8, %cst_8 {dimension_numbers = #tpu.dot_dimension_numbers<[1], [0], [0], [1], [0, 0, 1, 1], [], []>} : vector<8x64xf32>, vector<64x16xf32>, vector<8x16xf32> -> vector<8x16xf32>
    %c0_9 = arith.constant 0 : index
    %c0_10 = arith.constant 0 : index
    %10 = vector.load %arg5[%c0_9, %c0_10] : memref<1x16xf32, #tpu.memory_space<vmem>>, vector<1x16xf32>
    %11 = vector.broadcast %10 : vector<1x16xf32> to vector<8x16xf32>
    %12 = arith.addf %9, %11 : vector<8x16xf32>
    %cst_11 = arith.constant 0.000000e+00 : f32
    %13 = vector.broadcast %cst_11 : f32 to vector<8x16xf32>
    %14 = arith.maximumf %12, %13 : vector<8x16xf32>
    %c0_12 = arith.constant 0 : index
    %c0_13 = arith.constant 0 : index
    %15 = vector.load %arg6[%c0_12, %c0_13] : memref<16x5xf32, #tpu.memory_space<vmem>>, vector<16x5xf32>
    %cst_14 = arith.constant dense<0.000000e+00> : vector<8x5xf32>
    %16 = tpu.matmul %14, %15, %cst_14 {dimension_numbers = #tpu.dot_dimension_numbers<[1], [0], [0], [1], [0, 0, 1, 1], [], []>} : vector<8x16xf32>, vector<16x5xf32>, vector<8x5xf32> -> vector<8x5xf32>
    %c0_15 = arith.constant 0 : index
    %c0_16 = arith.constant 0 : index
    %17 = vector.load %arg7[%c0_15, %c0_16] : memref<1x5xf32, #tpu.memory_space<vmem>>, vector<1x5xf32>
    %18 = vector.broadcast %17 : vector<1x5xf32> to vector<8x5xf32>
    %19 = arith.addf %16, %18 : vector<8x5xf32>
    %20 = vector.extract_strided_slice %19 {offsets = [0, 4], sizes = [8, 1], strides = [1, 1]} : vector<8x5xf32> to vector<8x1xf32>
    %cst_17 = arith.constant 0.000000e+00 : f32
    %21 = vector.broadcast %cst_17 : f32 to vector<8x1xf32>
    %22 = arith.maximumf %20, %21 : vector<8x1xf32>
    %23 = vector.extract_strided_slice %19 {offsets = [0, 0], sizes = [8, 4], strides = [1, 1]} : vector<8x5xf32> to vector<8x4xf32>
    %c0_18 = arith.constant 0 : index
    %c0_19 = arith.constant 0 : index
    %24 = vector.load %arg8[%c0_18, %c0_19] : memref<1x4xf32, #tpu.memory_space<vmem>>, vector<1x4xf32>
    %25 = vector.broadcast %22 : vector<8x1xf32> to vector<8x4xf32>
    %26 = vector.broadcast %24 : vector<1x4xf32> to vector<8x4xf32>
    %27 = arith.mulf %25, %26 : vector<8x4xf32>
    %28 = arith.addf %23, %27 : vector<8x4xf32>
    %cst_20 = arith.constant 0.000000e+00 : f32
    %29 = vector.broadcast %cst_20 : f32 to vector<8x4xf32>
    %30 = arith.maximumf %28, %29 : vector<8x4xf32>
    %c0_21 = arith.constant 0 : index
    %c0_22 = arith.constant 0 : index
    %31 = vector.load %arg9[%c0_21, %c0_22] : memref<4x1xf32, #tpu.memory_space<vmem>>, vector<4x1xf32>
    %cst_23 = arith.constant dense<0.000000e+00> : vector<8x1xf32>
    %32 = tpu.matmul %30, %31, %cst_23 {dimension_numbers = #tpu.dot_dimension_numbers<[1], [0], [0], [1], [0, 0, 1, 1], [], []>} : vector<8x4xf32>, vector<4x1xf32>, vector<8x1xf32> -> vector<8x1xf32>
    %c0_24 = arith.constant 0 : index
    %c0_25 = arith.constant 0 : index
    %33 = vector.load %arg10[%c0_24, %c0_25] : memref<1x1xf32, #tpu.memory_space<vmem>>, vector<1x1xf32>
    %34 = vector.broadcast %33 : vector<1x1xf32> to vector<8x1xf32>
    %35 = arith.addf %32, %34 : vector<8x1xf32>
    %36 = arith.negf %35 : vector<8x1xf32>
    %37 = math.exp %36 : vector<8x1xf32>
    %cst_26 = arith.constant 1.000000e+00 : f32
    %38 = vector.broadcast %cst_26 : f32 to vector<8x1xf32>
    %39 = arith.addf %38, %37 : vector<8x1xf32>
    %40 = arith.divf %38, %39 : vector<8x1xf32>
    %c0_27 = arith.constant 0 : index
    %c0_28 = arith.constant 0 : index
    %41 = vector.load %arg11[%c0_27, %c0_28] : memref<8x2xf32, #tpu.memory_space<vmem>>, vector<8x1xf32>
    tpu.vector_store %arg11[%c0_27, %c0_28], %40 {strides = array<i32>} : memref<8x2xf32, #tpu.memory_space<vmem>>, vector<8x1xf32>,
    %c0_29 = arith.constant 0 : index
    %c1 = arith.constant 1 : index
    %42 = vector.load %arg11[%c0_29, %c1] : memref<8x2xf32, #tpu.memory_space<vmem>>, vector<8x1xf32>
    tpu.vector_store %arg11[%c0_29, %c1], %22 {strides = array<i32>} : memref<8x2xf32, #tpu.memory_space<vmem>>, vector<8x1xf32>,
    return
  }
  func.func @transform_0(%arg0: i32) -> (i32, i32) {
    %c0_i32 = arith.constant 0 : i32
    %c0_i32_0 = arith.constant 0 : i32
    return %arg0, %c0_i32 : i32, i32
  }
  func.func @transform_1(%arg0: i32) -> (i32, i32) {
    %c0_i32 = arith.constant 0 : i32
    %c0_i32_0 = arith.constant 0 : i32
    %c0_i32_1 = arith.constant 0 : i32
    return %c0_i32, %c0_i32_0 : i32, i32
  }
  func.func @transform_2(%arg0: i32) -> (i32, i32) {
    %c0_i32 = arith.constant 0 : i32
    %c0_i32_0 = arith.constant 0 : i32
    %c0_i32_1 = arith.constant 0 : i32
    return %c0_i32, %c0_i32_0 : i32, i32
  }
  func.func @transform_3(%arg0: i32) -> (i32, i32) {
    %c0_i32 = arith.constant 0 : i32
    %c0_i32_0 = arith.constant 0 : i32
    %c0_i32_1 = arith.constant 0 : i32
    return %c0_i32, %c0_i32_0 : i32, i32
  }
  func.func @transform_4(%arg0: i32) -> (i32, i32) {
    %c0_i32 = arith.constant 0 : i32
    %c0_i32_0 = arith.constant 0 : i32
    %c0_i32_1 = arith.constant 0 : i32
    return %c0_i32, %c0_i32_0 : i32, i32
  }
  func.func @transform_5(%arg0: i32) -> (i32, i32) {
    %c0_i32 = arith.constant 0 : i32
    %c0_i32_0 = arith.constant 0 : i32
    %c0_i32_1 = arith.constant 0 : i32
    return %c0_i32, %c0_i32_0 : i32, i32
  }
  func.func @transform_6(%arg0: i32) -> (i32, i32) {
    %c0_i32 = arith.constant 0 : i32
    %c0_i32_0 = arith.constant 0 : i32
    %c0_i32_1 = arith.constant 0 : i32
    return %c0_i32, %c0_i32_0 : i32, i32
  }
  func.func @transform_7(%arg0: i32) -> (i32, i32) {
    %c0_i32 = arith.constant 0 : i32
    %c0_i32_0 = arith.constant 0 : i32
    %c0_i32_1 = arith.constant 0 : i32
    return %c0_i32, %c0_i32_0 : i32, i32
  }
  func.func @transform_8(%arg0: i32) -> (i32, i32) {
    %c0_i32 = arith.constant 0 : i32
    %c0_i32_0 = arith.constant 0 : i32
    %c0_i32_1 = arith.constant 0 : i32
    return %c0_i32, %c0_i32_0 : i32, i32
  }
  func.func @transform_9(%arg0: i32) -> (i32, i32) {
    %c0_i32 = arith.constant 0 : i32
    %c0_i32_0 = arith.constant 0 : i32
    %c0_i32_1 = arith.constant 0 : i32
    return %c0_i32, %c0_i32_0 : i32, i32
  }
  func.func @transform_10(%arg0: i32) -> (i32, i32) {
    %c0_i32 = arith.constant 0 : i32
    %c0_i32_0 = arith.constant 0 : i32
    return %arg0, %c0_i32 : i32, i32
  }
}

</mosaic_0001>

<bundles_post_ra>
// kernel: tpu_custom_call.1
= control target key start
LH: loop header
LB: loop body
LE: loop exit
PB: predicated region body
PF: predicated region fallthrough
CT: control target
= control target key end

     0   :  { %v540_v3 = vmov 0.0   ;;  %vm541_vm0 = vmmov 0   ;;  %vm164_vm1 = vcmask 523264   ;;  %vm248_vm2 = vcmask 130048   ;;  %s543_s25 = smov 125   ;;  %s772_s1 = inlined_call_operand.vmem [shape: f32[256,64], index: 1, kind: input, shape index: {}]   ;;  %s773_s0 = inlined_call_operand.vmem [shape: f32[8,256], index: 0, kind: input, shape index: {}]   ;;  %s774_s3 = inlined_call_operand.vmem [shape: f32[64,16], index: 3, kind: input, shape index: {}]   ;;  %s775_s2 = inlined_call_operand.vmem [shape: f32[1,64], index: 2, kind: input, shape index: {}]   ;;  %s776_s5 = inlined_call_operand.vmem [shape: f32[16,5], index: 5, kind: input, shape index: {}]   ;;  %s777_s4 = inlined_call_operand.vmem [shape: f32[1,16], index: 4, kind: input, shape index: {}]   ;;  %s778_s6 = inlined_call_operand.vmem [shape: f32[1,5], index: 6, kind: input, shape index: {}]   ;;  %s779_s8 = inlined_call_operand.vmem [shape: f32[4,1], index: 8, kind: input, shape index: {}]   ;;  %s780_s9 = inlined_call_operand.<no memory space> [shape: f32[1,1], index: 9, kind: input, shape index: {}]   ;;  %s781_s7 = inlined_call_operand.vmem [shape: f32[1,4], index: 7, kind: input, shape index: {}]   ;;  %s782_s10 = inlined_call_operand.vmem [shape: f32[8,2], index: 10, kind: output, shape index: {}]  }
   0x1   :  { %v70_v0 = vld [vmem:[%s772_s1 + $0xf8] sm:$0xff]  ;;  %v69_v2 = vld [vmem:[%s772_s1 + $0xf0] sm:$0xff]  ;;  %500 = vmatprep.subr.mxu1 %v540_v3  ;;  %v68_v5 = vld [vmem:[%s772_s1 + $0xe8] sm:$0xff]  ;;  %516 = vmatprep.mubr.msk.f32.mxu1 %vm541_vm0, %v540_v3  ;;  %v542_v56 = vmov 4   ;;  %vm350_vm3 = vcmask 1043456   ;;  %v15_v63 = vstv %s780_s9  ;;  %vm346_vm4 = vcmask 31744  }
   0x2   :  { %v54_v1 = vld [vmem:[%s772_s1 + $0x78] sm:$0xff]  ;;  %451 = vmatprep.subr.mxu0 %v70_v0  ;;  %v53_v4 = vld [vmem:[%s772_s1 + $0x70] sm:$0xff]  ;;  %v52_v6 = vld [vmem:[%s772_s1 + $0x68] sm:$0xff]  ;;  %535 = vset.pattern.permute.xlu0 %v542_v56  ;;  %16 = vst [vmem:[#allocation2] sm:$0x1] %v15_v63  ;;  %vm430_vm5 = vcmask 7168  }
   0x3   :  { %452 = vmatpush3.msra.mxu0 %v54_v1  ;;  %v67_v7 = vld [vmem:[%s772_s1 + $0xe0] sm:$0xff]  ;;  %v66_v9 = vld [vmem:[%s772_s1 + $0xd8] sm:$0xff]  ;;  %v65_v11 = vld [vmem:[%s772_s1 + $0xd0] sm:$0xff]  ;;  %vm435_vm6 = vcmask 15368  }
   0x4   :  { %453 = vmatprep.subr.mxu0 %v69_v2  ;;  %v51_v8 = vld [vmem:[%s772_s1 + $0x60] sm:$0xff]  ;;  %v50_v10 = vld [vmem:[%s772_s1 + $0x58] sm:$0xff]  ;;  %v49_v12 = vld [vmem:[%s772_s1 + $0x50] sm:$0xff] }
   0x5   :  { %454 = vmatpush3.msra.mxu0 %v53_v4  ;;  %v64_v13 = vld [vmem:[%s772_s1 + $0xc8] sm:$0xff]  ;;  %v156_v16 = vld [vmem:[%s774_s3 + $0x38] sm:$0xff]  ;;  %v155_v17 = vld [vmem:[%s774_s3 + $0x30] sm:$0xff] }
   0x6   :  { %455 = vmatprep.subr.mxu0 %v68_v5  ;;  %v38_v14 = vld [vmem:[%s773_s0 + $0x8] sm:$0xff]  ;;  %v63_v18 = vld [vmem:[%s772_s1 + $0xc0] sm:$0xff]  ;;  %501 = vmatpush3.msra.mxu1 %v156_v16  ;;  %v62_v21 = vld [vmem:[%s772_s1 + $0xb8] sm:$0xff] }
   0x7   :  { %456 = vmatpush3.msra.mxu0 %v52_v6  ;;  %v48_v15 = vld [vmem:[%s772_s1 + $0x48] sm:$0xff]  ;;  %142 = vmatprep.mubr.f32.mxu0 %v38_v14  ;;  %v47_v19 = vld [vmem:[%s772_s1 + $0x40] sm:$0xff]  ;;  %v46_v22 = vld [vmem:[%s772_s1 + $0x38] sm:$0xff] }
   0x8   :  { %457 = vmatprep.subr.mxu0 %v67_v7  ;;  %502 = vmatprep.subr.mxu1 %v540_v3  ;;  %v154_v20 = vld [vmem:[%s774_s3 + $0x28] sm:$0xff]  ;;  %v61_v23 = vld [vmem:[%s772_s1 + $0xb0] sm:$0xff]  ;;  %v59_v27 = vld [vmem:[%s772_s1 + $0xa0] sm:$0xff] }
   0x9   :  { %458 = vmatpush3.msra.mxu0 %v51_v8  ;;  %503 = vmatpush3.msra.mxu1 %v155_v17  ;;  %v45_v24 = vld [vmem:[%s772_s1 + $0x30] sm:$0xff]  ;;  %v60_v25 = vld [vmem:[%s772_s1 + $0xa8] sm:$0xff]  ;;  %v43_v28 = vld [vmem:[%s772_s1 + $0x20] sm:$0xff] }
   0xa   :  { %459 = vmatprep.subr.mxu0 %v66_v9  ;;  %504 = vmatprep.subr.mxu1 %v540_v3  ;;  %v44_v26 = vld [vmem:[%s772_s1 + $0x28] sm:$0xff]  ;;  %v58_v29 = vld [vmem:[%s772_s1 + $0x98] sm:$0xff]  ;;  %v57_v31 = vld [vmem:[%s772_s1 + $0x90] sm:$0xff] }
   0xb   :  { %460 = vmatpush3.msra.mxu0 %v50_v10  ;;  %505 = vmatpush3.msra.mxu1 %v154_v20  ;;  %v42_v30 = vld [vmem:[%s772_s1 + $0x18] sm:$0xff]  ;;  %v41_v32 = vld [vmem:[%s772_s1 + $0x10] sm:$0xff]  ;;  %v56_v33 = vld [vmem:[%s772_s1 + $0x88] sm:$0xff] }
   0xc   :  { %461 = vmatprep.subr.mxu0 %v65_v11  ;;  %506 = vmatprep.subr.mxu1 %v540_v3  ;;  %v40_v34 = vld [vmem:[%s772_s1 + $0x8] sm:$0xff]  ;;  %v55_v35 = vld [vmem:[%s772_s1 + $0x80] sm:$0xff]  ;;  %v152_v39 = vld [vmem:[%s774_s3 + $0x18] sm:$0xff] }
   0xd   :  { %462 = vmatpush3.msra.mxu0 %v49_v12  ;;  %v39_v36 = vld [vmem:[%s772_s1] sm:$0xff]  ;;  %v151_v40 = vld [vmem:[%s774_s3 + $0x10] sm:$0xff]  ;;  %v150_v41 = vld [vmem:[%s774_s3 + $0x8] sm:$0xff] }
   0xe   :  { %463 = vmatprep.subr.mxu0 %v64_v13  ;;  %v37_v37 = vld [vmem:[%s773_s0] sm:$0xff]  ;;  %v240_v49 = vld [vmem:[%s776_s5 + $0x8] sm:$0xff] }
   0xf   :  { %464 = vmatpush3.msra.mxu0 %v48_v15  ;;  %v153_v38 = vld [vmem:[%s774_s3 + $0x20] sm:$0xff] }
  0x10   :  { %465 = vmatprep.subr.mxu0 %v63_v18  ;;  %507 = vmatpush3.msra.mxu1 %v153_v38  ;;  %v149_v42 = vld [vmem:[%s774_s3] sm:$0xff] }
  0x11   :  { %466 = vmatpush3.msra.mxu0 %v47_v19  ;;  %508 = vmatprep.subr.mxu1 %v540_v3  ;;  %v441_v44 = vld [vmem:[%s775_s2] ss:$0 sm:$0xff] }
  0x12   :  { %467 = vmatprep.subr.mxu0 %v62_v21  ;;  %509 = vmatpush3.msra.mxu1 %v152_v39  ;;  %v239_v50 = vld [vmem:[%s776_s5] sm:$0xff] }
  0x13   :  { %468 = vmatpush3.msra.mxu0 %v46_v22  ;;  %510 = vmatprep.subr.mxu1 %v540_v3  ;;  %v442_v51 = vld [vmem:[%s777_s4] ss:$0 sm:$0xff] }
  0x14   :  { %469 = vmatprep.subr.mxu0 %v61_v23  ;;  %511 = vmatpush3.msra.mxu1 %v151_v40  ;;  %v444_v57 = vld [vmem:[%s778_s6] ss:$0 sm:$0xff] }
  0x15   :  { %470 = vmatpush3.msra.mxu0 %v45_v24  ;;  %512 = vmatprep.subr.mxu1 %v540_v3  ;;  %v338_v62 = vld [vmem:[%s779_s8] sm:$0xf] }
  0x16   :  { %471 = vmatprep.subr.mxu0 %v60_v25  ;;  %513 = vmatpush3.msra.mxu1 %v150_v41  ;;  %v446_v0 = vld [vmem:[%s781_s7] ss:$0 sm:$0xff] }
  0x17   :  { %472 = vmatpush3.msra.mxu0 %v44_v26  ;;  %514 = vmatprep.subr.mxu1 %v540_v3  ;;  %v447_v5 = vld [vmem:[#allocation2] ss:$0 sm:$0xff] }
  0x18   :  { %473 = vmatprep.subr.mxu0 %v59_v27  ;;  %515 = vmatpush3.msra.mxu1 %v149_v42 }
  0x19   :  { %474 = vmatpush3.msra.mxu0 %v43_v28  ;;  %519 = vmatprep.subr.mxu1 %v540_v3 }
  0x1a   :  { %475 = vmatprep.subr.mxu0 %v58_v29 }
  0x1b   :  { %476 = vmatpush3.msra.mxu0 %v42_v30 }
  0x1c   :  { %477 = vmatprep.subr.mxu0 %v57_v31 }
  0x1d   :  { %478 = vmatpush3.msra.mxu0 %v41_v32 }
  0x1e   :  { %479 = vmatprep.subr.mxu0 %v56_v33 }
  0x1f   :  { %480 = vmatpush3.msra.mxu0 %v40_v34 }
  0x20   :  { %481 = vmatprep.subr.mxu0 %v55_v35 }
  0x21   :  { %482 = vmatpush3.msra.mxu0 %v39_v36 }
  0x22   :  { %143 = vmatmul.mubr.f32.vlgmr.msra.gmra.mxu0 %v37_v37 }
  0xe2   :  { %v483_v43 = vpop.f32.mrf.mxu0 }
  0xe4   :  { %v484_v45 = vpop.f32.mrf.mxu0 }
  0xe5   :  { %v485_v46 = vadd.f32 %v484_v45, %v483_v43 }
  0xe7   :  { %v145_v47 = vadd.f32 %v485_v46, %v441_v44 }
  0xe9   :  { %v148_v48 = vmax.f32 %v145_v47, 0.0 }
  0xeb   :  { %517 = vmatmul.mubr.msk.f32.vlgmr.msra.gmra.mxu1 %vm164_vm1, %v148_v48 }
  0xec   :  { %523 = vmatprep.mubr.msk.f32.mxu1 %vm541_vm0, %v540_v3  ;;  %520 = vmatpush3.msra.mxu1 %v240_v49 }
  0xed   :  { %521 = vmatprep.subr.mxu1 %v540_v3 }
  0xee   :  { %522 = vmatpush3.msra.mxu1 %v239_v50 }
  0xef   :  { %526 = vmatprep.subr.mxu1 %v540_v3 }
 0x1ab   :  { %v234_v52 = vpop.f32.mrf.mxu1 }
 0x1ac   :  { %v235_v53 = vadd.f32 %v442_v51, %v234_v52 }
 0x1ad   :  { %v518_v54 = vpop.f32.mrf.mxu1 }
 0x1ae   :  { %v238_v55 = vmax.f32 %v235_v53, 0.0 }
 0x1b0   :  { %524 = vmatmul.mubr.msk.f32.vlgmr.msra.gmra.mxu1 %vm248_vm2, %v238_v55 }
 0x1b1   :  { %528 = vmatprep.mubr.msk.f32.mxu1 %vm541_vm0, %v540_v3  ;;  %527 = vmatpush3.msk.msra.mxu1 %vm350_vm3, %v338_v62 }
 0x270   :  { %v318_v58 = vpop.f32.mrf.mxu1 }
 0x271   :  { %v319_v59 = vadd.f32 %v444_v57, %v318_v58 }
 0x272   :  { %v525_v60 = vpop.f32.mrf.mxu1 }
 0x273   :  { %v322_v61 = vmax.f32 %v319_v59, 0.0 }
 0x275   :  { %326 = vperm.xlu0 %535, %v322_v61  }
 0x279   :  { %432 = vrot.lane.b32.xlu0 %v322_v61, %s543_s25 }
 0x2f0   :  { %v327_v1 = vpop.permute.xlu0 %326 }
 0x2f1   :  { %v335_v2 = vmul.f32 %v446_v0, %v327_v1 }
 0x2f3   :  { %v336_v3 = vadd.f32 %v335_v2, %v319_v59 }
 0x2f4   :  { %v433_v13 = vpop.permute.xlu0 %432 }
 0x2f5   :  { %v337_v4 = vmax.f32 %v336_v3, 0.0 }
 0x2f7   :  { %529 = vmatmul.mubr.msk.f32.vlgmr.msra.gmra.mxu1 %vm346_vm4, %v337_v4 }
 0x3b7   :  { %v420_v6 = vpop.f32.mrf.mxu1 }
 0x3b8   :  { %v421_v7 = vadd.f32 %v447_v5, %v420_v6 }
 0x3b9   :  { %v530_v8 = vpop.f32.mrf.mxu1 }
 0x3ba   :  { %v450_v9 = vmul.f32 -1.442695, %v421_v7 }
 0x3bc   :  { %536 = vpow2.f32 %v450_v9 }
 0x3c9   :  { %v537_v10 = vpop.eup %536 }
 0x3ca   :  { %v427_v11 = vadd.f32 1.0, %v537_v10 }
 0x3cc   :  { %538 = vrcp.f32 %v427_v11 }
 0x3d9   :  { %v539_v12 = vpop.eup %538 }
 0x3da   :  { %431 = vst.msk [vmem:[%s782_s10] sm:$0xff] %vm430_vm5, %v539_v12 }
 0x3db   :  { %436 = vst.msk [vmem:[%s782_s10] sm:$0xff] %vm435_vm6, %v433_v13 }

</bundles_post_ra>
